<compile_context>
chip_gen: v6e
topology: v6e:2x2x1
jax: 0.10.0
libtpu: 0.0.40
codegen_flags: <defaults>
</compile_context>

<pallas_src>
import functools
import math

import jax
import jax.numpy as jnp
from jax.experimental import pallas as pl
from jax.experimental.pallas import tpu as pltpu


def _round_up(x, m):
    return ((x + m - 1) // m) * m


def _sdpa_kernel(q_ref, k_ref, v_ref, o_ref, m_sc, l_sc, acc_sc, *,
                 scale, lk_valid, tk, mask_kv):
    # q_ref: (tq, Dp)  k_ref: (tk, Dp)  v_ref: (tk, Dvp)  o_ref: (tq, Dvp)
    ki = pl.program_id(2)
    nk = pl.num_programs(2)

    @pl.when(ki == 0)
    def _():
        m_sc[...] = jnp.full_like(m_sc, -jnp.inf)
        l_sc[...] = jnp.zeros_like(l_sc)
        acc_sc[...] = jnp.zeros_like(acc_sc)

    q = q_ref[...].astype(jnp.float32)
    if scale:  # fold scale into Q (Lq*D work instead of Lq*Lk)
        q = q * jnp.float32(scale)
    k = k_ref[...].astype(jnp.float32)

    # scores (tq, tk) = q @ k^T : contract feature axis of both, no transpose op.
    s = jax.lax.dot_general(q, k, (((1,), (1,)), ((), ())),
                            preferred_element_type=jnp.float32)

    if mask_kv:
        col = ki * tk + jax.lax.broadcasted_iota(jnp.int32, s.shape, 1)
        s = jnp.where(col < lk_valid, s, jnp.float32(-1e30))

    # online softmax update
    m_prev = m_sc[...]
    m_new = jnp.maximum(m_prev, jnp.max(s, axis=-1, keepdims=True))
    alpha = jnp.exp(m_prev - m_new)
    p = jnp.exp(s - m_new)

    l_sc[...] = alpha * l_sc[...] + jnp.sum(p, axis=-1, keepdims=True)
    pv = jax.lax.dot_general(p.astype(v_ref.dtype), v_ref[...],
                             (((1,), (0,)), ((), ())),
                             preferred_element_type=jnp.float32)
    acc_sc[...] = alpha * acc_sc[...] + pv
    m_sc[...] = m_new

    @pl.when(ki == nk - 1)
    def _():
        inv = pl.reciprocal(l_sc[...], approx=True)
        o_ref[...] = (acc_sc[...] * inv).astype(o_ref.dtype)


def scaled_dot_product_attention(Q, K, V, scale=None):
    """Pallas equivalent of Scaled_Dot_Product_Attention.forward.

    Q: [B, Lq, D], K: [B, Lk, D], V: [B, Lk, Dv], scale: optional python float.
    """
    B, Lq, D = Q.shape
    Bk, Lk, Dk = K.shape
    Bv, Lv, Dv = V.shape
    assert Dk == D and Lv == Lk and Bk == B and Bv == B

    # Lane-dense, MXU-aligned feature dims (zero padding is exact for QK^T / PV).
    Dp = _round_up(D, 128)
    Dvp = _round_up(Dv, 128)

    # Sequence tiles: Q tile <= 128 (sublane-aligned), KV tile <= 512 (lane-aligned).
    tq = min(128, _round_up(Lq, 8))
    Lq_p = _round_up(Lq, tq)
    tk = min(512, _round_up(Lk, 128))
    Lk_p = _round_up(Lk, tk)

    Qp = jnp.pad(Q, ((0, 0), (0, Lq_p - Lq), (0, Dp - D)))
    Kp = jnp.pad(K, ((0, 0), (0, Lk_p - Lk), (0, Dp - D)))
    Vp = jnp.pad(V, ((0, 0), (0, Lk_p - Lk), (0, Dvp - Dv)))

    n_q = Lq_p // tq
    n_k = Lk_p // tk

    kernel = functools.partial(
        _sdpa_kernel,
        scale=scale,
        lk_valid=Lk,
        tk=tk,
        mask_kv=(Lk_p != Lk),
    )

    out = pl.pallas_call(
        kernel,
        out_shape=jax.ShapeDtypeStruct((B, Lq_p, Dvp), Q.dtype),
        grid=(B, n_q, n_k),
        in_specs=[
            pl.BlockSpec((None, tq, Dp), lambda b, qi, ki: (b, qi, 0)),
            pl.BlockSpec((None, tk, Dp), lambda b, qi, ki: (b, ki, 0)),
            pl.BlockSpec((None, tk, Dvp), lambda b, qi, ki: (b, ki, 0)),
        ],
        out_specs=pl.BlockSpec((None, tq, Dvp), lambda b, qi, ki: (b, qi, 0)),
        scratch_shapes=[
            pltpu.VMEM((tq, 1), jnp.float32),   # running max m
            pltpu.VMEM((tq, 1), jnp.float32),   # running denom l
            pltpu.VMEM((tq, Dvp), jnp.float32),  # running context acc
        ],
        compiler_params=pltpu.CompilerParams(
            dimension_semantics=("parallel", "parallel", "arbitrary"),
            vmem_limit_bytes=32 * 1024 * 1024,
        ),
    )(Qp, Kp, Vp)

    return out[:, :Lq, :Dv]


def _reference(Q, K, V, scale=None):
    s = jnp.einsum("bqd,bkd->bqk", Q, K).astype(jnp.float32)
    if scale:
        s = s * scale
    attn = jax.nn.softmax(s, axis=-1)
    return jnp.einsum("bqk,bkd->bqd", attn, V.astype(jnp.float32)).astype(Q.dtype)


if __name__ == "__main__":
    key = jax.random.PRNGKey(0)

    # Case 1: small shapes consistent with the module (batch=2, seq=8, hidden=32).
    kq, kk, kv = jax.random.split(key, 3)
    B, Lq, Lk, D, Dv = 2, 8, 8, 32, 32
    Q = jax.random.normal(kq, (B, Lq, D), dtype=jnp.float32)
    K = jax.random.normal(kk, (B, Lk, D), dtype=jnp.float32)
    V = jax.random.normal(kv, (B, Lk, Dv), dtype=jnp.float32)
    scale = 1.0 / math.sqrt(D)  # paper's sqrt(dim_K) scaling

    out = scaled_dot_product_attention(Q, K, V, scale=scale)
    out = jax.block_until_ready(out)
    ref = _reference(Q, K, V, scale=scale)
    assert out.shape == (B, Lq, Dv)
    assert jnp.allclose(out, ref, atol=2e-3, rtol=2e-3)

    # Case 2: ragged shapes to exercise padding + KV masking paths.
    kq2, kk2, kv2 = jax.random.split(jax.random.PRNGKey(1), 3)
    B2, Lq2, Lk2, D2, Dv2 = 2, 20, 75, 48, 40
    Q2 = jax.random.normal(kq2, (B2, Lq2, D2), dtype=jnp.float32)
    K2 = jax.random.normal(kk2, (B2, Lk2, D2), dtype=jnp.float32)
    V2 = jax.random.normal(kv2, (B2, Lk2, Dv2), dtype=jnp.float32)

    out2 = scaled_dot_product_attention(Q2, K2, V2, scale=1.0 / math.sqrt(D2))
    out2 = jax.block_until_ready(out2)
    ref2 = _reference(Q2, K2, V2, scale=1.0 / math.sqrt(D2))
    assert out2.shape == (B2, Lq2, Dv2)
    assert jnp.allclose(out2, ref2, atol=2e-3, rtol=2e-3)

    print("KERNEL_OK")
</pallas_src>

<mosaic_0001>
module attributes {stable_mosaic.version = 11 : i64} {
  func.func @_sdpa_kernel(%arg0: i32, %arg1: i32, %arg2: i32, %arg3: memref<1x8x128xf32, #tpu.memory_space<vmem>>, %arg4: memref<1x128x128xf32, #tpu.memory_space<vmem>>, %arg5: memref<1x128x128xf32, #tpu.memory_space<vmem>>, %arg6: memref<1x8x128xf32, #tpu.memory_space<vmem>>, %arg7: memref<8x1xf32, #tpu.memory_space<vmem>>, %arg8: memref<8x1xf32, #tpu.memory_space<vmem>>, %arg9: memref<8x128xf32, #tpu.memory_space<vmem>>) attributes {dimension_semantics = [#tpu.dimension_semantics<parallel>, #tpu.dimension_semantics<parallel>, #tpu.dimension_semantics<arbitrary>], iteration_bounds = array<i64: 2, 1, 1>, scalar_prefetch = 0 : i64, scratch_operands = 3 : i64, tpu.core_type = #tpu.core_type<tc>, window_params = [{transform_indices = @transform_0, window_bounds = array<i64: 1, 8, 128>}, {transform_indices = @transform_1, window_bounds = array<i64: 1, 128, 128>}, {transform_indices = @transform_2, window_bounds = array<i64: 1, 128, 128>}, {transform_indices = @transform_3, window_bounds = array<i64: 1, 8, 128>}]} {
    %c0_i32 = arith.constant 0 : i32
    %0 = arith.cmpi eq, %arg2, %c0_i32 : i32
    %1 = arith.extui %0 : i1 to i32
    %c0_i32_0 = arith.constant 0 : i32
    %2 = arith.cmpi ne, %1, %c0_i32_0 : i32
    scf.if %2 {
      %cst_28 = arith.constant 0xFF800000 : f32
      %45 = vector.broadcast %cst_28 : f32 to vector<8x1xf32>
      %c0_29 = arith.constant 0 : index
      %c0_30 = arith.constant 0 : index
      %46 = vector.load %arg7[%c0_29, %c0_30] : memref<8x1xf32, #tpu.memory_space<vmem>>, vector<8x1xf32>
      tpu.vector_store %arg7[%c0_29, %c0_30], %45 {strides = array<i32>} : memref<8x1xf32, #tpu.memory_space<vmem>>, vector<8x1xf32>,
      %cst_31 = arith.constant 0.000000e+00 : f32
      %47 = vector.broadcast %cst_31 : f32 to vector<8x1xf32>
      %c0_32 = arith.constant 0 : index
      %c0_33 = arith.constant 0 : index
      %48 = vector.load %arg8[%c0_32, %c0_33] : memref<8x1xf32, #tpu.memory_space<vmem>>, vector<8x1xf32>
      tpu.vector_store %arg8[%c0_32, %c0_33], %47 {strides = array<i32>} : memref<8x1xf32, #tpu.memory_space<vmem>>, vector<8x1xf32>,
      %cst_34 = arith.constant 0.000000e+00 : f32
      %49 = vector.broadcast %cst_34 : f32 to vector<8x128xf32>
      %c0_35 = arith.constant 0 : index
      %c0_36 = arith.constant 0 : index
      %50 = vector.load %arg9[%c0_35, %c0_36] : memref<8x128xf32, #tpu.memory_space<vmem>>, vector<8x128xf32>
      tpu.vector_store %arg9[%c0_35, %c0_36], %49 {strides = array<i32>} : memref<8x128xf32, #tpu.memory_space<vmem>>, vector<8x128xf32>,
    } else {
    }
    %c0 = arith.constant 0 : index
    %c0_1 = arith.constant 0 : index
    %c0_2 = arith.constant 0 : index
    %3 = vector.load %arg3[%c0, %c0_1, %c0_2] : memref<1x8x128xf32, #tpu.memory_space<vmem>>, vector<1x8x128xf32>
    %4 = vector.shape_cast %3 : vector<1x8x128xf32> to vector<8x128xf32>
    %cst = arith.constant 0.176776692 : f32
    %5 = vector.broadcast %cst : f32 to vector<8x128xf32>
    %6 = arith.mulf %4, %5 : vector<8x128xf32>
    %c0_3 = arith.constant 0 : index
    %c0_4 = arith.constant 0 : index
    %c0_5 = arith.constant 0 : index
    %7 = vector.load %arg4[%c0_3, %c0_4, %c0_5] : memref<1x128x128xf32, #tpu.memory_space<vmem>>, vector<1x128x128xf32>
    %8 = vector.shape_cast %7 : vector<1x128x128xf32> to vector<128x128xf32>
    %cst_6 = arith.constant dense<0.000000e+00> : vector<8x128xf32>
    %9 = tpu.matmul %6, %8, %cst_6 {dimension_numbers = #tpu.dot_dimension_numbers<[1], [1], [0], [0], [0, 0, 1, 0], [], []>} : vector<8x128xf32>, vector<128x128xf32>, vector<8x128xf32> -> vector<8x128xf32>
    %c128_i32 = arith.constant 128 : i32
    %10 = arith.muli %arg2, %c128_i32 : i32
    %11 = tpu.iota {dimensions = array<i32: 1>} : vector<8x128xi32>
    %12 = vector.broadcast %10 : i32 to vector<8x128xi32>
    %13 = arith.addi %12, %11 : vector<8x128xi32>
    %c8_i32 = arith.constant 8 : i32
    %14 = vector.broadcast %c8_i32 : i32 to vector<8x128xi32>
    %15 = arith.cmpi slt, %13, %14 : vector<8x128xi32>
    %cst_7 = arith.constant -1.000000e+30 : f32
    %16 = vector.broadcast %cst_7 : f32 to vector<8x128xf32>
    %17 = arith.select %15, %9, %16 : vector<8x128xi1>, vector<8x128xf32>
    %c0_8 = arith.constant 0 : index
    %c0_9 = arith.constant 0 : index
    %18 = vector.load %arg7[%c0_8, %c0_9] : memref<8x1xf32, #tpu.memory_space<vmem>>, vector<8x1xf32>
    %cst_10 = arith.constant dense<0xFF800000> : vector<8xf32>
    %19 = vector.multi_reduction <maximumf>, %17, %cst_10 [1] : vector<8x128xf32> to vector<8xf32>
    %20 = vector.shape_cast %19 : vector<8xf32> to vector<8x1xf32>
    %21 = arith.maximumf %18, %20 : vector<8x1xf32>
    %22 = arith.subf %18, %21 : vector<8x1xf32>
    %23 = math.exp %22 : vector<8x1xf32>
    %24 = vector.broadcast %21 : vector<8x1xf32> to vector<8x128xf32>
    %25 = arith.subf %17, %24 : vector<8x128xf32>
    %26 = math.exp %25 : vector<8x128xf32>
    %c0_11 = arith.constant 0 : index
    %c0_12 = arith.constant 0 : index
    %27 = vector.load %arg8[%c0_11, %c0_12] : memref<8x1xf32, #tpu.memory_space<vmem>>, vector<8x1xf32>
    %28 = arith.mulf %23, %27 : vector<8x1xf32>
    %cst_13 = arith.constant dense<0.000000e+00> : vector<8xf32>
    %29 = vector.multi_reduction <add>, %26, %cst_13 [1] : vector<8x128xf32> to vector<8xf32>
    %30 = vector.shape_cast %29 : vector<8xf32> to vector<8x1xf32>
    %31 = arith.addf %28, %30 : vector<8x1xf32>
    %c0_14 = arith.constant 0 : index
    %c0_15 = arith.constant 0 : index
    %32 = vector.load %arg8[%c0_14, %c0_15] : memref<8x1xf32, #tpu.memory_space<vmem>>, vector<8x1xf32>
    tpu.vector_store %arg8[%c0_14, %c0_15], %31 {strides = array<i32>} : memref<8x1xf32, #tpu.memory_space<vmem>>, vector<8x1xf32>,
    %c0_16 = arith.constant 0 : index
    %c0_17 = arith.constant 0 : index
    %c0_18 = arith.constant 0 : index
    %33 = vector.load %arg5[%c0_16, %c0_17, %c0_18] : memref<1x128x128xf32, #tpu.memory_space<vmem>>, vector<1x128x128xf32>
    %34 = vector.shape_cast %33 : vector<1x128x128xf32> to vector<128x128xf32>
    %cst_19 = arith.constant dense<0.000000e+00> : vector<8x128xf32>
    %35 = tpu.matmul %26, %34, %cst_19 {dimension_numbers = #tpu.dot_dimension_numbers<[1], [0], [0], [1], [0, 0, 1, 1], [], []>} : vector<8x128xf32>, vector<128x128xf32>, vector<8x128xf32> -> vector<8x128xf32>
    %c0_20 = arith.constant 0 : index
    %c0_21 = arith.constant 0 : index
    %36 = vector.load %arg9[%c0_20, %c0_21] : memref<8x128xf32, #tpu.memory_space<vmem>>, vector<8x128xf32>
    %37 = vector.broadcast %23 : vector<8x1xf32> to vector<8x128xf32>
    %38 = arith.mulf %37, %36 : vector<8x128xf32>
    %39 = arith.addf %38, %35 : vector<8x128xf32>
    %c0_22 = arith.constant 0 : index
    %c0_23 = arith.constant 0 : index
    %40 = vector.load %arg9[%c0_22, %c0_23] : memref<8x128xf32, #tpu.memory_space<vmem>>, vector<8x128xf32>
    tpu.vector_store %arg9[%c0_22, %c0_23], %39 {strides = array<i32>} : memref<8x128xf32, #tpu.memory_space<vmem>>, vector<8x128xf32>,
    %c0_24 = arith.constant 0 : index
    %c0_25 = arith.constant 0 : index
    %41 = vector.load %arg7[%c0_24, %c0_25] : memref<8x1xf32, #tpu.memory_space<vmem>>, vector<8x1xf32>
    tpu.vector_store %arg7[%c0_24, %c0_25], %21 {strides = array<i32>} : memref<8x1xf32, #tpu.memory_space<vmem>>, vector<8x1xf32>,
    %c0_i32_26 = arith.constant 0 : i32
    %42 = arith.cmpi eq, %arg2, %c0_i32_26 : i32
    %43 = arith.extui %42 : i1 to i32
    %c0_i32_27 = arith.constant 0 : i32
    %44 = arith.cmpi ne, %43, %c0_i32_27 : i32
    scf.if %44 {
      %c0_28 = arith.constant 0 : index
      %c0_29 = arith.constant 0 : index
      %45 = vector.load %arg8[%c0_28, %c0_29] : memref<8x1xf32, #tpu.memory_space<vmem>>, vector<8x1xf32>
      %46 = tpu.reciprocal %45 {approx = true} : vector<8x1xf32> -> vector<8x1xf32>
      %c0_30 = arith.constant 0 : index
      %c0_31 = arith.constant 0 : index
      %47 = vector.load %arg9[%c0_30, %c0_31] : memref<8x128xf32, #tpu.memory_space<vmem>>, vector<8x128xf32>
      %48 = vector.broadcast %46 : vector<8x1xf32> to vector<8x128xf32>
      %49 = arith.mulf %47, %48 : vector<8x128xf32>
      %c0_32 = arith.constant 0 : index
      %c0_33 = arith.constant 0 : index
      %c0_34 = arith.constant 0 : index
      %50 = vector.load %arg6[%c0_32, %c0_33, %c0_34] : memref<1x8x128xf32, #tpu.memory_space<vmem>>, vector<1x8x128xf32>
      %51 = vector.shape_cast %50 : vector<1x8x128xf32> to vector<8x128xf32>
      %52 = vector.shape_cast %49 : vector<8x128xf32> to vector<1x8x128xf32>
      tpu.vector_store %arg6[%c0_32, %c0_33, %c0_34], %52 {strides = array<i32>} : memref<1x8x128xf32, #tpu.memory_space<vmem>>, vector<1x8x128xf32>,
    } else {
    }
    return
  }
  func.func @transform_0(%arg0: i32, %arg1: i32, %arg2: i32) -> (i32, i32, i32) {
    %c0_i32 = arith.constant 0 : i32
    %c0_i32_0 = arith.constant 0 : i32
    return %arg0, %arg1, %c0_i32 : i32, i32, i32
  }
  func.func @transform_1(%arg0: i32, %arg1: i32, %arg2: i32) -> (i32, i32, i32) {
    %c0_i32 = arith.constant 0 : i32
    %c0_i32_0 = arith.constant 0 : i32
    return %arg0, %arg2, %c0_i32 : i32, i32, i32
  }
  func.func @transform_2(%arg0: i32, %arg1: i32, %arg2: i32) -> (i32, i32, i32) {
    %c0_i32 = arith.constant 0 : i32
    %c0_i32_0 = arith.constant 0 : i32
    return %arg0, %arg2, %c0_i32 : i32, i32, i32
  }
  func.func @transform_3(%arg0: i32, %arg1: i32, %arg2: i32) -> (i32, i32, i32) {
    %c0_i32 = arith.constant 0 : i32
    %c0_i32_0 = arith.constant 0 : i32
    return %arg0, %arg1, %c0_i32 : i32, i32, i32
  }
}

</mosaic_0001>

<bundles_post_ra>
// kernel: tpu_custom_call.1
= control target key start
LH: loop header
LB: loop body
LE: loop exit
PB: predicated region body
PF: predicated region fallthrough
CT: control target
= control target key end

     0   :  { %s1372_s0 = inlined_call_operand.hbm [shape: f32[2,8,128], index: 0, kind: input, shape index: {}]   ;;  %s1373_s1 = inlined_call_operand.hbm [shape: f32[2,128,128], index: 1, kind: input, shape index: {}]   ;;  %s1374_s2 = inlined_call_operand.hbm [shape: f32[2,128,128], index: 2, kind: input, shape index: {}]   ;;  %s1375_s3 = inlined_call_operand.hbm [shape: f32[2,8,128], index: 3, kind: output, shape index: {}]  }
   0x1   :  { %1379 = sst [smem:[#allocation18_spill]] %s1373_s1 }
   0x2   :  { %8 = vsyncpa [#allocation6], 0 }
   0x3   :  { %10 = vsyncpa [#allocation6 + $0x1], 0 }
   0x4   :  { %11 = vsyncpa [#allocation9], 0 }
   0x5   :  { %13 = vsyncpa [#allocation9 + $0x1], 0 }
   0x6   :  { %14 = vsyncpa [#allocation7], 0 }
   0x7   :  { %16 = vsyncpa [#allocation7 + $0x1], 0  ;;  %s1091_s12 = smov 0   ;;  %s1093_s13 = smov 0  }
   0x8   :  { %s1095_s14 = smov 0   ;;  %s1097_s15 = smov 0  }
   0x9   :  { %s1099_s16 = smov 0   ;;  %s1101_s17 = smov 0  }
   0xa LB: > { %1380 = sst [smem:[#allocation15_spill]] %s1047_s14  ;;  %s1122_s18 = sadd.s32 4294967295, %s1059_s17   ;;  %s1059_s17 = sphi %s1101_s17, %s22_s17   ;;  %s1055_s16 = sphi %s1099_s16, %s1398_s16   ;;  %s1051_s15 = sphi %s1097_s15, %s1397_s15   ;;  %s1047_s14 = sphi %s1095_s14, %s1393_s14   ;;  %s1043_s13 = sphi %s1093_s13, %s1396_s13   ;;  %s1039_s12 = sphi %s1091_s12, %s1395_s12  }
   0xb   : > { %s679_s19 = sadd.s32 4294967294, %s1059_s17   ;;  %s41_s20 = sadd.s32 1, %s1055_s16 }
   0xc   : > { %s50_s21 = sadd.s32 1, %s1047_s14  ;;  %p43_p0 = scmp.ge.s32.totalorder %s41_s20, 2 }
   0xd   : > { %p57_p1 = scmp.ne.s32.totalorder %s1047_s14, %s1043_s13  ;;  %p58_p2 = scmp.eq.s32.totalorder %s1059_s17, 0 }
   0xe   : > { %p63_p3 = scmp.ne.s32.totalorder %s1043_s13, %s1039_s12  ;;  %s1400_s20 = smov (%p43_p0, %s41_s20), 0 }
   0xf   : > { %1381 = sst [smem:[#allocation16_spill]] %s1400_s20  ;;  %p1134_p4 = por %p58_p2, %p57_p1 }
  0x10   : > { %p64_p5 = scmp.eq.s32.totalorder %s1122_s18, 0  ;;  %s45_s23 = ssub.s32 %s1055_s16, %s1400_s20 }
  0x11   : > { %p145_p6 = scmp.eq.s32.totalorder %s1122_s18, 1  ;;  %p48_p7 = scmp.eq.s32.totalorder %s45_s23, 0 }
  0x12   : > { %p1142_p8 = por %p64_p5, %p63_p3  ;;  %p151_p10 = scmp.eq.s32.totalorder %s679_s19, 1 }
  0x13   : > { %p1146_p9 = por %p145_p6, %p57_p1  ;;  %p827_p13 = scmp.lt.s32.totalorder %s1059_s17, 2 }
  0x14   : > { %s1151_s26 = scalar_select %p48_p7, %s1047_s14, %s50_s21  }
  0x15   : > { %p1153_p11 = por %p151_p10, %p63_p3  ;;  %s1160_s28 = sand.u32 1, %s1047_s14  }
  0x16   : > { %1385 = sst [smem:[#allocation17_spill]] %s1151_s26  ;;  %s190_s29 = sand.u32 1, %s1059_s17  }
  0x17   : > { %s684_s30 = sshll.u32 %s1160_s28, 7  ;;  %p1166_p0 = pnand %p827_p13, %p1134_p4 }
  0x18   : > { %s699_s5 = sshll.u32 %s1055_s16, 11  ;;  %s1388_s1 = sld [smem:[#allocation18_spill]] }
  0x19   : > { %s194_s9 = scalar_lea.vmem [#allocation8], %s684_s30  ;;  %s1176_s11 = scalar_lea.sflag [#allocation9], %s190_s29 }
  0x1a   : > { %s203_s10 = sshll.u32 %s194_s9, 4  ;;  %p893_p1 = pneg %p1166_p0  ;;  %s204_s10 = int_to_ptr.vmem [resolvable:$true] %s203_s10 }
  0x1b   : > { %s904_s19 = scalar_lea.vmem %s204_s10, 2048  ;;  %s1061_s21 = smov [#allocation8]  }
  0x1c   : > { %p905_p2 = scmp.ne.s32.totalorder %s204_s10, %s904_s19  ;;  %s909_s22 = sshll.u32 %s1061_s21, 4  ;;  %s910_s22 = int_to_ptr.vmem [resolvable:$false] %s909_s22 }
  0x1d   : > { %s911_s23 = scalar_lea.vmem %s910_s22, 4096  ;;  %p912_p5 = scmp.lt.s32.totalorder %s204_s10, %s910_s22 }
  0x1e   : > { %s202_s8 = scalar_lea.hbm %s1388_s1, %s699_s5  ;;  %p907_p3 = pnand %p905_p2, %p893_p1 }
  0x1f   : > { %p913_p6 = scmp.lt.s32.totalorder %s911_s23, %s904_s19 }
  0x20   : > { %p908_p4 = pneg %p907_p3 }
  0x21   : > { %p914_p7 = por %p913_p6, %p912_p5 }
  0x23   : > { %p915_p10 = pnand %p914_p7, %p908_p4 }
  0x25   : > { %918 = shalt.err (!%p915_p10)
}
  0x26   : > { %s1378_s6 = smov 128   ;;  %s1063_s29 = smov 8  }
  0x27   : > { %819 = dma.hbm_to_vmem [thread:$0]  (!%p1166_p0), %s202_s8, 2048, %s204_s10, %s1176_s11, %s1378_s6, %s1378_s6, %s1063_s29  }
  0x28   : > { %s1192_s19 = scalar_lea.hbm %s1374_s2, %s699_s5  ;;  %p690_p13 = scmp.ge.s32.totalorder %s1059_s17, 1 }
  0x29   : > { %s217_s21 = scalar_lea.vmem [#allocation10], %s684_s30  ;;  %p234_p2 = scmp.lt.s32.totalorder %s1059_s17, 3 }
  0x2a   : > { %s226_s22 = sshll.u32 %s217_s21, 4  ;;  %s682_s1 = sshll.u32 %s1160_s28, 3  ;;  %s1207_s22 = int_to_ptr.vmem [resolvable:$true] %s226_s22 }
  0x2b   : > { %p1198_p3 = pnand %p690_p13, %p234_p2  ;;  %s683_s20 = sshll.u32 %s1055_s16, 7 }
  0x2c   : > { %s181_s8 = scalar_lea.hbm %s1372_s0, %s683_s20  ;;  %s175_s5 = scalar_lea.vmem [#allocation5], %s682_s1 }
  0x2d   : > { %s183_s10 = sshll.u32 %s175_s5, 4  ;;  %s172_s7 = scalar_lea.sflag [#allocation6], %s1160_s28  ;;  %s184_s10 = int_to_ptr.vmem [resolvable:$true] %s183_s10 }
  0x2e   : > { %s932_s9 = scalar_lea.vmem %s184_s10, 128  ;;  %s1064_s30 = smov [#allocation5]  }
  0x2f   : > { %p933_p4 = scmp.ne.s32.totalorder %s184_s10, %s932_s9  ;;  %s937_s21 = sshll.u32 %s1064_s30, 4  ;;  %s938_s21 = int_to_ptr.vmem [resolvable:$false] %s937_s21 }
  0x30   : > { %s939_s6 = scalar_lea.vmem %s938_s21, 256  ;;  %p940_p7 = scmp.lt.s32.totalorder %s184_s10, %s938_s21 }
  0x31   : > { %p935_p5 = pnand %p933_p4, %p893_p1  ;;  %p941_p10 = scmp.lt.s32.totalorder %s939_s6, %s932_s9 }
  0x33   : > { %p936_p6 = pneg %p935_p5  ;;  %p942_p13 = por %p941_p10, %p940_p7 }
  0x35   : > { %p943_p2 = pnand %p942_p13, %p936_p6 }
  0x37   : > { %946 = shalt.err (!%p943_p2)
}
  0x38   : > { %816 = dma.hbm_to_vmem [thread:$0]  (!%p1166_p0), %s181_s8, 128, %s184_s10, %s172_s7  }
  0x39   : > { %s960_s1 = scalar_lea.vmem %s1207_s22, 2048  ;;  %s1065_s14 = smov [#allocation10]  }
  0x3a   : > { %p961_p12 = scmp.ne.s32.totalorder %s1207_s22, %s960_s1  ;;  %s965_s20 = sshll.u32 %s1065_s14, 4  ;;  %s966_s20 = int_to_ptr.vmem [resolvable:$false] %s965_s20 }
  0x3b   : > { %s967_s26 = scalar_lea.vmem %s966_s20, 4096  ;;  %p968_p7 = scmp.lt.s32.totalorder %s1207_s22, %s966_s20 }
  0x3c   : > { %p963_p4 = pnand %p961_p12, %p893_p1  ;;  %p969_p6 = scmp.lt.s32.totalorder %s967_s26, %s960_s1 }
  0x3e   : > { %p964_p5 = pneg %p963_p4  ;;  %p970_p10 = por %p969_p6, %p968_p7 }
  0x40   : > { %p971_p13 = pnand %p970_p10, %p964_p5 }
  0x42   : > { %974 = shalt.err (!%p971_p13)
}
  0x43   : > { %s1390_s28 = smov 128   ;;  %238 = sbr.rel (%p1198_p3) target bundleno = 919 (0x397), region = 32 }
  0x44   : > { %822 = dma.hbm_to_vmem [thread:$0]  (!%p1166_p0), %s1192_s19, 2048, %s1207_s22, %s1176_s11, %s1390_s28, %s1390_s28, %s1063_s29  }
  0x45   : > { %s1232_s6 = sand.u32 (!%p1198_p3), 1, %s1043_s13  }
  0x46   : > { %s691_s8 = sshll.u32 (!%p1198_p3), %s1232_s6, 3  ;;  %s241_s5 = scalar_lea.sflag (!%p1198_p3), [#allocation6], %s1232_s6 }
  0x47   : > { %s1238_s4 = scalar_lea.vmem (!%p1198_p3), [#allocation5], %s691_s8 }
  0x48   : > { %1026 = dma.done.wait (%p1142_p8), %s241_s5, 128  }
  0x49   : > { %1028 = vsyncadd (%p1142_p8), %s241_s5, 4294967168  ;;  %s249_s11 = sand.u32 1, %s1122_s18   ;;  %s692_s29 = sshll.u32 %s1232_s6, 7 }
  0x4a   : > { %s250_s19 = scalar_lea.sflag [#allocation9], %s249_s11  ;;  %s1248_s22 = scalar_lea.vmem [#allocation8], %s692_s29 }
  0x4b   : > { %1030 = dma.done.wait (%p1142_p8), %s250_s19, 4096  }
  0x4c   : > { %1032 = vsyncadd (%p1142_p8), %s250_s19, 4294963200  ;;  %v1066_v0 = vmov 0.0   ;;  %vm1067_vm0 = vmmov 0   ;;  %v322_v1 = vld [vmem:[%s1248_s22 + $0x78] sm:$0xff]  ;;  %v321_v2 = vld [vmem:[%s1248_s22 + $0x70] sm:$0xff]  ;;  %vm301_vm1 = vcmask 7168   ;;  %v394_v20 = vlaneseq }
  0x4d   : > { %735 = vmatprep.subr.mxu0 %v1066_v0  ;;  %767 = vmatprep.mubr.msk.f32.mxu0 %vm1067_vm0, %v1066_v0  ;;  %v320_v3 = vld [vmem:[%s1248_s22 + $0x68] sm:$0xff]  ;;  %v319_v4 = vld [vmem:[%s1248_s22 + $0x60] sm:$0xff]  ;;  %v318_v5 = vld [vmem:[%s1248_s22 + $0x58] sm:$0xff]  ;;  %v1068_v19 = vmov -inf   ;;  %303 = vst.msk [vmem:[#allocation3] sm:$0xff] %vm301_vm1, %v1066_v0  ;;  %v1069_v25 = vmov 0  }
  0x4e   : > { %770 = vmatprep.subr.mxu1 %v1066_v0  ;;  %802 = vmatprep.mubr.msk.f32.mxu1 %vm1067_vm0, %v1066_v0  ;;  %v317_v6 = vld [vmem:[%s1248_s22 + $0x50] sm:$0xff]  ;;  %v316_v7 = vld [vmem:[%s1248_s22 + $0x48] sm:$0xff]  ;;  %v315_v8 = vld [vmem:[%s1248_s22 + $0x40] sm:$0xff]  ;;  %302 = vst.msk [vmem:[#allocation2] sm:$0xff] %vm301_vm1, %v1068_v19  ;;  %v395_v21 = vand.u32 127, %v394_v20  ;;  %s1295_s18 = scalar_lea.vmem [#allocation10], %s692_s29 }
  0x4f   : > { %736 = vmatpush3.xpose.msra.mxu0 %v322_v1  ;;  %v314_v9 = vld [vmem:[%s1248_s22 + $0x38] sm:$0xff]  ;;  %v313_v10 = vld [vmem:[%s1248_s22 + $0x30] sm:$0xff]  ;;  %v312_v11 = vld [vmem:[%s1248_s22 + $0x28] sm:$0xff]  ;;  %883 = vset.pattern.permute.xlu0 %v1069_v25  ;;  %s696_s24 = sshll.u32 %s1051_s15, 7  ;;  %s294_s23 = scalar_lea.vmem [#allocation11], %s691_s8 }
  0x50   : > { %737 = vmatprep.subr.mxu0 %v1066_v0  ;;  %v311_v12 = vld [vmem:[%s1248_s22 + $0x20] sm:$0xff]  ;;  %v310_v13 = vld [vmem:[%s1248_s22 + $0x18] sm:$0xff]  ;;  %v309_v14 = vld [vmem:[%s1248_s22 + $0x10] sm:$0xff]  ;;  %vm398_vm2 = vcmp.lt.s32.totalorder %v395_v21, 8  ;;  %884 = vset.pattern.permute.xlu1 %v1069_v25  ;;  %s546_s10 = sshll.u32 %s294_s23, 4  ;;  %s544_s30 = scalar_lea.hbm %s1375_s3, %s696_s24  ;;  %s547_s10 = int_to_ptr.vmem [resolvable:$true] %s546_s10 }
  0x51   : > { %v308_v15 = vld [vmem:[%s1248_s22 + $0x8] sm:$0xff]  ;;  %v305_v16 = vld [vmem:[%s1238_s4] sm:$0xff]  ;;  %v307_v17 = vld [vmem:[%s1248_s22] sm:$0xff]  ;;  %s532_s21 = scalar_lea.sflag [#allocation7], %s1232_s6  ;;  %s975_s1 = scalar_lea.vmem %s547_s10, 128 }
  0x52   : > { %v306_v18 = vmul.f32 0.17677669, %v305_v16  ;;  %v437_v26 = vld [vmem:[%s1295_s18 + $0x78] sm:$0xff]  ;;  %v436_v27 = vld [vmem:[%s1295_s18 + $0x70] sm:$0xff]  ;;  %v435_v28 = vld [vmem:[%s1295_s18 + $0x68] sm:$0xff]  ;;  %p976_p8 = scmp.ne.s32.totalorder %s547_s10, %s975_s1  ;;  %s1070_s14 = smov [#allocation11]  }
  0x53   : > { %738 = vmatpush3.xpose.msra.mxu0 %v321_v2  ;;  %771 = vmatpush3.msra.mxu1 %v437_v26  ;;  %v434_v29 = vld [vmem:[%s1295_s18 + $0x60] sm:$0xff]  ;;  %v433_v30 = vld [vmem:[%s1295_s18 + $0x58] sm:$0xff]  ;;  %v432_v31 = vld [vmem:[%s1295_s18 + $0x50] sm:$0xff]  ;;  %s979_s15 = sshll.u32 %s1070_s14, 4  ;;  %s980_s15 = int_to_ptr.vmem [resolvable:$false] %s979_s15 }
  0x54   : > { %739 = vmatprep.subr.mxu0 %v1066_v0  ;;  %772 = vmatprep.subr.mxu1 %v1066_v0  ;;  %v431_v32 = vld [vmem:[%s1295_s18 + $0x48] sm:$0xff]  ;;  %v430_v34 = vld [vmem:[%s1295_s18 + $0x40] sm:$0xff]  ;;  %v429_v37 = vld [vmem:[%s1295_s18 + $0x38] sm:$0xff]  ;;  %p977_p12 = pnand %p976_p8, %p1146_p9  ;;  %s981_s20 = scalar_lea.vmem %s980_s15, 256 }
  0x55   : > { %773 = vmatpush3.msra.mxu1 %v436_v27  ;;  %v400_v33 = vld [vmem:[#allocation2] sm:$0xff]  ;;  %v428_v39 = vld [vmem:[%s1295_s18 + $0x30] sm:$0xff]  ;;  %v427_v40 = vld [vmem:[%s1295_s18 + $0x28] sm:$0xff]  ;;  %p982_p1 = scmp.lt.s32.totalorder %s547_s10, %s980_s15  ;;  %p983_p3 = scmp.lt.s32.totalorder %s981_s20, %s975_s1 }
  0x56   : > { %774 = vmatprep.subr.mxu1 %v1066_v0  ;;  %v426_v41 = vld [vmem:[%s1295_s18 + $0x20] sm:$0xff]  ;;  %v425_v42 = vld [vmem:[%s1295_s18 + $0x18] sm:$0xff]  ;;  %v424_v43 = vld [vmem:[%s1295_s18 + $0x10] sm:$0xff]  ;;  %p978_p0 = pneg %p977_p12 }
  0x57   : > { %740 = vmatpush3.xpose.msra.mxu0 %v320_v3  ;;  %775 = vmatpush3.msra.mxu1 %v435_v28  ;;  %v423_v44 = vld [vmem:[%s1295_s18 + $0x8] sm:$0xff]  ;;  %v422_v45 = vld [vmem:[%s1295_s18] sm:$0xff]  ;;  %p984_p2 = por %p983_p3, %p982_p1 }
  0x58   : > { %741 = vmatprep.subr.mxu0 %v1066_v0  ;;  %776 = vmatprep.subr.mxu1 %v1066_v0  ;;  %v415_v52 = vld [vmem:[#allocation3] sm:$0xff] }
  0x59   : > { %777 = vmatpush3.msra.mxu1 %v434_v29  ;;  %p985_p4 = pnand %p984_p2, %p978_p0 }
  0x5a   : > { %778 = vmatprep.subr.mxu1 %v1066_v0 }
  0x5b   : > { %742 = vmatpush3.xpose.msra.mxu0 %v319_v4  ;;  %779 = vmatpush3.msra.mxu1 %v433_v30 }
  0x5c   : > { %743 = vmatprep.subr.mxu0 %v1066_v0  ;;  %780 = vmatprep.subr.mxu1 %v1066_v0 }
  0x5d   : > { %781 = vmatpush3.msra.mxu1 %v432_v31 }
  0x5e   : > { %782 = vmatprep.subr.mxu1 %v1066_v0 }
  0x5f   : > { %744 = vmatpush3.xpose.msra.mxu0 %v318_v5  ;;  %783 = vmatpush3.msra.mxu1 %v431_v32 }
  0x60   : > { %745 = vmatprep.subr.mxu0 %v1066_v0  ;;  %784 = vmatprep.subr.mxu1 %v1066_v0 }
  0x61   : > { %785 = vmatpush3.msra.mxu1 %v430_v34 }
  0x62   : > { %786 = vmatprep.subr.mxu1 %v1066_v0 }
  0x63   : > { %746 = vmatpush3.xpose.msra.mxu0 %v317_v6  ;;  %787 = vmatpush3.msra.mxu1 %v429_v37 }
  0x64   : > { %747 = vmatprep.subr.mxu0 %v1066_v0  ;;  %788 = vmatprep.subr.mxu1 %v1066_v0 }
  0x65   : > { %789 = vmatpush3.msra.mxu1 %v428_v39 }
  0x66   : > { %790 = vmatprep.subr.mxu1 %v1066_v0 }
  0x67   : > { %748 = vmatpush3.xpose.msra.mxu0 %v316_v7  ;;  %791 = vmatpush3.msra.mxu1 %v427_v40 }
  0x68   : > { %749 = vmatprep.subr.mxu0 %v1066_v0  ;;  %792 = vmatprep.subr.mxu1 %v1066_v0 }
  0x69   : > { %793 = vmatpush3.msra.mxu1 %v426_v41 }
  0x6a   : > { %794 = vmatprep.subr.mxu1 %v1066_v0 }
  0x6b   : > { %750 = vmatpush3.xpose.msra.mxu0 %v315_v8  ;;  %795 = vmatpush3.msra.mxu1 %v425_v42 }
  0x6c   : > { %751 = vmatprep.subr.mxu0 %v1066_v0  ;;  %796 = vmatprep.subr.mxu1 %v1066_v0 }
  0x6d   : > { %797 = vmatpush3.msra.mxu1 %v424_v43 }
  0x6e   : > { %798 = vmatprep.subr.mxu1 %v1066_v0 }
  0x6f   : > { %752 = vmatpush3.xpose.msra.mxu0 %v314_v9  ;;  %799 = vmatpush3.msra.mxu1 %v423_v44 }
  0x70   : > { %753 = vmatprep.subr.mxu0 %v1066_v0  ;;  %800 = vmatprep.subr.mxu1 %v1066_v0 }
  0x71   : > { %801 = vmatpush3.msra.mxu1 %v422_v45 }
  0x73   : > { %754 = vmatpush3.xpose.msra.mxu0 %v313_v10 }
  0x74   : > { %755 = vmatprep.subr.mxu0 %v1066_v0 }
  0x77   : > { %756 = vmatpush3.xpose.msra.mxu0 %v312_v11 }
  0x78   : > { %757 = vmatprep.subr.mxu0 %v1066_v0 }
  0x7b   : > { %758 = vmatpush3.xpose.msra.mxu0 %v311_v12 }
  0x7c   : > { %759 = vmatprep.subr.mxu0 %v1066_v0 }
  0x7f   : > { %760 = vmatpush3.xpose.msra.mxu0 %v310_v13 }
  0x80   : > { %761 = vmatprep.subr.mxu0 %v1066_v0 }
  0x83   : > { %762 = vmatpush3.xpose.msra.mxu0 %v309_v14 }
  0x84   : > { %763 = vmatprep.subr.mxu0 %v1066_v0 }
  0x87   : > { %764 = vmatpush3.xpose.msra.mxu0 %v308_v15 }
  0x88   : > { %765 = vmatprep.subr.mxu0 %v1066_v0 }
  0x8b   : > { %766 = vmatpush3.xpose.msra.mxu0 %v307_v17 }
  0x8e   : > { %768 = vmatmul.mubr.f32.vlgmr.msra.gmra.mxu0 %v306_v18 }
 0x14e   : > { %v389_v22 = vpop.f32.mrf.mxu0 }
 0x14f   : > { %v399_v23 = vsel %vm398_vm2, %v389_v22, -1e+30 }
 0x150   : > { %401 = vmax.xlane.f32.xlu0 %v399_v23  ;;  %v769_v24 = vpop.f32.mrf.mxu0 }
 0x1d9   : > { %v402_v35 = vpop.xlane.xlu0 %401 }
 0x1da   : > { %v403_v36 = vmax.f32 %v400_v33, %v402_v35 }
 0x1dc   : > { %v404_v38 = vsub.f32 %v400_v33, %v403_v36  ;;  %517 = vst.msk [vmem:[#allocation2] sm:$0xff] %vm301_vm1, %v403_v36  ;;  %409 = vperm.xlu0 %883, %v403_v36  }
 0x1de   : > { %v405_v50 = vmul.f32 1.442695, %v404_v38 }
 0x257   : > { %v410_v46 = vpop.permute.xlu0 %409 }
 0x258   : > { %v412_v47 = vsub.f32 %v399_v23, %v410_v46 }
 0x25a   : > { %v413_v48 = vmul.f32 1.442695, %v412_v47 }
 0x25c   : > { %885 = vpow2.f32 %v413_v48 }
 0x25d   : > { %887 = vpow2.f32 %v405_v50 }
 0x269   : > { %v886_v49 = vpop.eup %885 }
 0x26a   : > { %417 = vadd.xlane.f32.xlu1 %v886_v49  ;;  %803 = vmatmul.mubr.f32.vlgmr.msra.gmra.mxu1 %v886_v49  ;;  %v888_v51 = vpop.eup %887 }
 0x26b   : > { %v416_v53 = vmul.f32 %v888_v51, %v415_v52 }
 0x27b   : > { %511 = vperm.xlu1 %884, %v888_v51  }
 0x2f3   : > { %v418_v54 = vpop.xlane.xlu1 %417 }
 0x2f4   : > { %v419_v55 = vadd.f32 %v418_v54, %v416_v53 }
 0x2f6   : > { %421 = vst.msk [vmem:[#allocation3] sm:$0xff] %vm301_vm1, %v419_v55 }
 0x2f7   : > { %v512_v60 = vpop.permute.xlu1 %511 }
 0x2f8   : > { %v514_v61 = vmul.f32 0.0, %v512_v60 }
 0x2fd   : > { %v521_v56 = vld [vmem:[#allocation3] sm:$0xff] }
 0x2fe   : > { %889 = vrcp.f32 %v521_v56 }
 0x30b   : > { %v890_v57 = vpop.eup %889 }
 0x30c   : > { %526 = vperm.xlu1 %884, %v890_v57  }
 0x32a   : > { %v504_v58 = vpop.f32.mrf.mxu1 }
 0x32b   : > { %v515_v62 = vadd.f32 %v514_v61, %v504_v58 }
 0x32c   : > { %v804_v59 = vpop.f32.mrf.mxu1 }
 0x387   : > { %v527_v63 = vpop.permute.xlu1 %526 }
 0x388   : > { %v529_v0 = vmul.f32 %v527_v63, %v515_v62 }
 0x38a   : > { %530 = vst [vmem:[%s294_s23] sm:$0xff] %v529_v0 }
 0x38b   : > { %988 = shalt.err (!%p985_p4)
}
 0x38c   : > { %s989_s26 = scalar_lea.hbm %s544_s30, 128  ;;  %s993_s8 = scalar_lea.hbm %s1375_s3, 256 }
 0x38d   : > { %p990_p5 = scmp.ne.s32.totalorder %s544_s30, %s989_s26  ;;  %p994_p10 = scmp.lt.s32.totalorder %s544_s30, %s1375_s3 }
 0x38e   : > { %p995_p13 = scmp.lt.s32.totalorder %s993_s8, %s989_s26 }
 0x38f   : > { %p991_p7 = pnand %p990_p5, %p1146_p9 }
 0x390   : > { %p996_p8 = por %p995_p13, %p994_p10 }
 0x391   : > { %p992_p6 = pneg %p991_p7 }
 0x393   : > { %p997_p12 = pnand %p996_p8, %p992_p6 }
 0x395   : > { %1000 = shalt.err (!%p997_p12)
}
 0x396   : > { %811 = dma.vmem_to_hbm [thread:$0]  (%p1146_p9), %s547_s10, 128, %s544_s30, %s532_s21  }
 0x397 PF: > { %s558_s11 = sand.u32 1, %s1039_s12   ;;  %p1391_p0 = scmp.ge.s32.totalorder %s1059_s17, 2 }
 0x398   : > { %s559_s29 = scalar_lea.sflag [#allocation7], %s558_s11 }
 0x399   : > { %p824_p1 = pnand %p1391_p0, %p1153_p11 }
 0x39b   : > { %p825_p3 = pneg %p824_p1 }
 0x39d   : > { %1034 = dma.done.wait (%p825_p3), %s559_s29, 128  }
 0x39e   : > { %1036 = vsyncadd (%p825_p3), %s559_s29, 4294967168  ;;  %s22_s17 = sadd.s32 1, %s1059_s17   ;;  %s1392_s19 = sld [smem:[#allocation15_spill]] }
 0x39f   : > { %p19_p2 = scmp.ge.s32.totalorder %s22_s17, 4   ;;  %s1393_s14 = sld [smem:[#allocation17_spill]] }
 0x3a0   : > { %s1394_s25 = sld [smem:[#allocation16_spill]]  ;;  %s1395_s12 = smov %s1043_s13 }
 0x3a1   : > { %s1397_s15 = smov %s1055_s16 }
 0x3a2   :  { %21 = sbr.rel (!%p19_p2) target bundleno = 10 (0xa), region = 109 }
 0x3a4   : > { %s1396_s13 = smov %s1392_s19 }
 0x3a6   : > { %s1398_s16 = smov %s1394_s25 }
 0x3a7   :  { %564 = vsyncpa [#allocation6], 1 }
 0x3a8   :  { %566 = vsyncpa [#allocation6 + $0x1], 1 }
 0x3a9   :  { %567 = vsyncpa [#allocation9], 1 }
 0x3aa   :  { %569 = vsyncpa [#allocation9 + $0x1], 1 }
 0x3ab   :  { %570 = vsyncpa [#allocation7], 1 }
 0x3ac   :  { %572 = vsyncpa [#allocation7 + $0x1], 1 }

</bundles_post_ra>
